<compile_context>
chip_gen: v6e
topology: v6e:2x2x1
jax: 0.10.0
libtpu: 0.0.40
codegen_flags: <defaults>
</compile_context>

<pallas_src>
import math

import jax
import jax.numpy as jnp
from jax import lax
from jax.experimental import pallas as pl
from jax.experimental.pallas import tpu as pltpu

N = 2            # batch (crystals) used in the demo; kernel itself is per-crystal
SEQ = 27         # fixed number of periodic images (hard-coded 27 in the PyTorch forward)
SEQ_PAD = 32     # images padded to a sublane-aligned count (pad keys masked)
D = 32           # layerNormSize / hidden width
H = 4            # attention heads
DH = D // H      # head dim
DFF = 64         # feed-forward inner width
EPS = 1e-5       # nn.LayerNorm default eps

# ---- per-crystal activation block layout: (ACT_ROWS, D) ----
#   rows 0:SEQ_PAD  lanes 0:3 = coords (rows SEQ:SEQ_PAD zero), lanes 3:D zero
#   row  SEQ_PAD    = x (the crystal feature vector), rows SEQ_PAD+1:ACT_ROWS zero
ACT_ROWS = SEQ_PAD + 8       # 40

# ---- 32-lane weight slab layout (all sections 8-row aligned) ----
WQ_OFF = 0                   # rows   0: 32  wq   (D, D)
WO_OFF = WQ_OFF + D          # rows  32: 64  wo   (D, D)
WF2_OFF = WO_OFF + D         # rows  64:128  wf2  (DFF, D)
WPOS_OFF = WF2_OFF + DFF     # rows 128:160  wpos padded to (D, D)  (rows 0:3 real)
VEC_OFF = WPOS_OFF + D       # rows 160:168  [bpos, g1, b1, bq, bo, g2, b2, bf2]
HM_OFF = VEC_OFF + 8         # rows 168:176  head_mask (H, D) in rows 168:172
KB_OFF = HM_OFF + 8          # rows 176:184  pad-key additive bias in row 176
SLAB32_ROWS = KB_OFF + 8     # 184

# ---- 64-lane weight slab layout ----
WKV_OFF = 0                  # rows  0:32  [wk | wv]  (D, 2D)
WF1_OFF = WKV_OFF + D        # rows 32:64  wf1        (D, DFF)
B64_OFF = WF1_OFF + D        # rows 64:72  row 64 = [bk | bv], row 65 = bf1
SLAB64_ROWS = B64_OFF + 8    # 72


def _layernorm(x, gamma, beta):
    mu = jnp.mean(x, axis=-1, keepdims=True)
    var = jnp.mean((x - mu) ** 2, axis=-1, keepdims=True)
    return (x - mu) * lax.rsqrt(var + EPS) * gamma + beta


def encoder_kernel(act_ref, s32_ref, s64_ref, out_ref):
    # ---- unpack weight slabs (all static, 8-aligned ref slices) ----
    wq = s32_ref[WQ_OFF:WQ_OFF + D, :]                    # (D, D)
    wo = s32_ref[WO_OFF:WO_OFF + D, :]                    # (D, D)
    wf2 = s32_ref[WF2_OFF:WF2_OFF + DFF, :]               # (DFF, D)
    wpos = s32_ref[WPOS_OFF:WPOS_OFF + D, :]              # (D, D), rows 3:D zero
    vecs = s32_ref[VEC_OFF:VEC_OFF + 8, :]                # (8, D)
    bpos = vecs[0:1, :]
    g1 = vecs[1:2, :]
    b1 = vecs[2:3, :]
    bq = vecs[3:4, :]
    bo = vecs[4:5, :]
    g2 = vecs[5:6, :]
    b2 = vecs[6:7, :]
    bf2 = vecs[7:8, :]
    head_mask = s32_ref[HM_OFF:HM_OFF + H, :]             # (H, D) constant
    key_bias = s32_ref[KB_OFF:KB_OFF + 1, :]              # (1, SEQ_PAD): 0 / -1e30

    wkv = s64_ref[WKV_OFF:WKV_OFF + D, :]                 # (D, 2D)
    wf1 = s64_ref[WF1_OFF:WF1_OFF + D, :]                 # (D, DFF)
    bkv = s64_ref[B64_OFF:B64_OFF + 1, :]                 # (1, 2D)
    bf1 = s64_ref[B64_OFF + 1:B64_OFF + 2, :]             # (1, DFF)

    # ---- per-crystal activations (one DMA'd block) ----
    coords32 = act_ref[0:SEQ_PAD, :]                      # (SEQ_PAD, D), lanes 3:D zero
    x_row = act_ref[SEQ_PAD:SEQ_PAD + 1, :]               # (1, D)

    # ---- position encoding: atom_reps = x + coords @ Wpos + bpos (broadcast in-kernel) ----
    atom_reps = x_row + jnp.dot(coords32, wpos, preferred_element_type=jnp.float32) + bpos

    # ---- sublayer[0] pre-norm; K/V over all rows, Q only for the image-0 row ----
    ln0 = _layernorm(atom_reps, g1, b1)                   # (SEQ_PAD, D)
    kv = jnp.dot(ln0, wkv, preferred_element_type=jnp.float32) + bkv   # (SEQ_PAD, 2D)
    k_all = kv[:, 0:D]
    v_all = kv[:, D:2 * D]

    ar0 = atom_reps[0:1, :]                               # image-0 residual row (aligned)
    q0 = jnp.dot(ln0[0:1, :], wq, preferred_element_type=jnp.float32) + bq   # (1, D)
    q_heads = jnp.broadcast_to(q0, (H, D)) * head_mask    # (H, D): row h holds head h lanes

    # scores[h, j] = <q0 | head h> . k[j]   (contract last dims, no k.T materialized)
    scores = lax.dot_general(
        q_heads, k_all, (((1,), (1,)), ((), ())),
        preferred_element_type=jnp.float32) * (1.0 / math.sqrt(DH))    # (H, SEQ_PAD)
    scores = scores + key_bias                            # mask the 5 pad keys

    m = jnp.max(scores, axis=-1, keepdims=True)
    p = jnp.exp(scores - m)
    l = jnp.sum(p, axis=-1, keepdims=True)
    p = p * pl.reciprocal(l, approx=False)

    ctx = jnp.dot(p, v_all, preferred_element_type=jnp.float32)        # (H, D)
    # re-assemble heads: output lane d comes from row d // DH
    attn = jnp.sum(ctx * head_mask, axis=0, keepdims=True)             # (1, D)
    attn = jnp.dot(attn, wo, preferred_element_type=jnp.float32) + bo

    # ---- mask_pre_use pooling == keep only the image-0 residual row ----
    pooled = ar0 + attn                                   # dropout == identity

    # ---- sublayer[1]: y + feed_forward(LayerNorm(y)) ----
    ln1 = _layernorm(pooled, g2, b2)
    hdn = jnp.maximum(
        jnp.dot(ln1, wf1, preferred_element_type=jnp.float32) + bf1, 0.0)
    ff = jnp.dot(hdn, wf2, preferred_element_type=jnp.float32) + bf2

    # full-tile (8, D) store; wrapper reads row 0
    out_ref[...] = jnp.broadcast_to(pooled + ff, (8, D))


def crystal_encoder_layer(x, coords, params):
    (wpos, bpos, g1, b1, wq, bq, wk, bk, wv, bv,
     wo, bo, g2, b2, wf1, bf1, wf2, bf2) = params

    n = x.shape[0]
    assert x.shape == (n, D), "x must be (batch, layerNormSize)"
    assert coords.shape == (n, SEQ, 3), "padded_coords_matrix must be (batch, 27, 3)"
    assert SEQ_PAD == D  # key-bias row reuses the 32-lane slab width

    # ---- per-crystal activation blocks (one DMA per grid step) ----
    coords_pad = jnp.zeros((n, SEQ_PAD, D), jnp.float32)
    coords_pad = coords_pad.at[:, :SEQ, 0:3].set(coords.astype(jnp.float32))
    x_rows = jnp.zeros((n, 8, D), jnp.float32)
    x_rows = x_rows.at[:, 0, :].set(x.astype(jnp.float32))
    act = jnp.concatenate([coords_pad, x_rows], axis=1).reshape(n * ACT_ROWS, D)

    # ---- 32-lane weight slab (weights + LN params + precomputed masks) ----
    wpos_pad = jnp.zeros((D, D), jnp.float32).at[0:3, :].set(wpos)
    vec_rows = jnp.concatenate([bpos, g1, b1, bq, bo, g2, b2, bf2], axis=0)      # (8, D)
    head_mask = ((jnp.arange(D)[None, :] // DH)
                 == jnp.arange(H)[:, None]).astype(jnp.float32)                  # (H, D)
    hm_rows = jnp.zeros((8, D), jnp.float32).at[0:H, :].set(head_mask)
    key_bias = jnp.where(jnp.arange(SEQ_PAD) < SEQ, 0.0, -1e30).astype(jnp.float32)
    kb_rows = jnp.zeros((8, D), jnp.float32).at[0, :].set(key_bias)
    slab32 = jnp.concatenate([wq, wo, wf2, wpos_pad, vec_rows, hm_rows, kb_rows], axis=0)
    assert slab32.shape == (SLAB32_ROWS, D)

    # ---- 64-lane weight slab (fused K/V projection + FF1) ----
    wkv = jnp.concatenate([wk, wv], axis=1)                                      # (D, 2D)
    bkv = jnp.concatenate([bk, bv], axis=1)                                      # (1, 2D)
    b64_rows = (jnp.zeros((8, 2 * D), jnp.float32)
                .at[0:1, :].set(bkv)
                .at[1:2, :].set(bf1))
    slab64 = jnp.concatenate([wkv, wf1, b64_rows], axis=0)
    assert slab64.shape == (SLAB64_ROWS, 2 * D)

    out = pl.pallas_call(
        encoder_kernel,
        out_shape=jax.ShapeDtypeStruct((n * 8, D), jnp.float32),
        grid=(n,),
        in_specs=[
            pl.BlockSpec((ACT_ROWS, D), lambda i: (i, 0)),          # per-crystal block
            pl.BlockSpec((SLAB32_ROWS, D), lambda i: (0, 0)),       # fetched once
            pl.BlockSpec((SLAB64_ROWS, 2 * D), lambda i: (0, 0)),   # fetched once
        ],
        out_specs=pl.BlockSpec((8, D), lambda i: (i, 0)),
        compiler_params=pltpu.CompilerParams(dimension_semantics=("parallel",)),
    )(act, slab32, slab64)

    return out.reshape(n, 8, D)[:, 0, :]


def reference(x, coords, params):
    (wpos, bpos, g1, b1, wq, bq, wk, bk, wv, bv,
     wo, bo, g2, b2, wf1, bf1, wf2, bf2) = params

    def ln(t, g, b):
        mu = t.mean(-1, keepdims=True)
        var = ((t - mu) ** 2).mean(-1, keepdims=True)
        return (t - mu) / jnp.sqrt(var + EPS) * g + b

    n = x.shape[0]
    atom_reps = x[:, None, :] + coords @ wpos + bpos          # (n, SEQ, D)
    l0 = ln(atom_reps, g1, b1)
    q = (l0 @ wq + bq).reshape(n, SEQ, H, DH)
    k = (l0 @ wk + bk).reshape(n, SEQ, H, DH)
    v = (l0 @ wv + bv).reshape(n, SEQ, H, DH)
    s = jnp.einsum('nqhd,nkhd->nhqk', q, k) / math.sqrt(DH)
    p = jax.nn.softmax(s, axis=-1)
    a = jnp.einsum('nhqk,nkhd->nqhd', p, v).reshape(n, SEQ, D)
    sub0 = atom_reps + (a @ wo + bo)
    mask = jnp.zeros((SEQ,), jnp.float32).at[0].set(1.0)
    pooled = (mask[None, :, None] * sub0).sum(1)              # (n, D)
    l1 = ln(pooled, g2, b2)
    ff = jnp.maximum(l1 @ wf1 + bf1, 0.0) @ wf2 + bf2
    return pooled + ff


if __name__ == "__main__":
    key = jax.random.PRNGKey(0)
    ks = jax.random.split(key, 12)

    def init(k, shape, scale=0.05):
        return (scale * jax.random.normal(k, shape)).astype(jnp.float32)

    # parameters (deterministic synthetic init); biases/LN params kept 2D (1, dim)
    wpos = init(ks[0], (3, D), 0.2);   bpos = jnp.zeros((1, D), jnp.float32)
    g1 = jnp.ones((1, D), jnp.float32); b1 = jnp.zeros((1, D), jnp.float32)
    wq = init(ks[1], (D, D)); bq = init(ks[2], (1, D), 0.01)
    wk = init(ks[3], (D, D)); bk = init(ks[4], (1, D), 0.01)
    wv = init(ks[5], (D, D)); bv = init(ks[6], (1, D), 0.01)
    wo = init(ks[7], (D, D)); bo = jnp.zeros((1, D), jnp.float32)
    g2 = jnp.ones((1, D), jnp.float32); b2 = jnp.zeros((1, D), jnp.float32)
    wf1 = init(ks[8], (D, DFF)); bf1 = init(ks[9], (1, DFF), 0.01)
    wf2 = init(ks[10], (DFF, D)); bf2 = jnp.zeros((1, D), jnp.float32)

    params = [wpos, bpos, g1, b1, wq, bq, wk, bk, wv, bv,
              wo, bo, g2, b2, wf1, bf1, wf2, bf2]

    kx, kc = jax.random.split(ks[11])
    x = jax.random.normal(kx, (N, D), jnp.float32)
    padded_coords_matrix = jax.random.normal(kc, (N, SEQ, 3), jnp.float32)

    out = crystal_encoder_layer(x, padded_coords_matrix, params)
    out = jax.block_until_ready(out)

    ref = reference(x, padded_coords_matrix, params)
    assert out.shape == (N, D)
    assert jnp.allclose(out, ref, atol=1e-4, rtol=1e-4), "mismatch vs JAX reference"

    print("KERNEL_OK")
</pallas_src>

<mosaic_0001>
module attributes {stable_mosaic.version = 11 : i64} {
  func.func @encoder_kernel(%arg0: i32, %arg1: memref<40x32xf32, #tpu.memory_space<vmem>>, %arg2: memref<184x32xf32, #tpu.memory_space<vmem>>, %arg3: memref<72x64xf32, #tpu.memory_space<vmem>>, %arg4: memref<8x32xf32, #tpu.memory_space<vmem>>) attributes {dimension_semantics = [#tpu.dimension_semantics<parallel>], iteration_bounds = array<i64: 2>, scalar_prefetch = 0 : i64, scratch_operands = 0 : i64, tpu.core_type = #tpu.core_type<tc>, window_params = [{transform_indices = @transform_0, window_bounds = array<i64: 40, 32>}, {pipeline_mode = #tpu.pipeline_mode<synchronous>, transform_indices = @transform_1, window_bounds = array<i64: 184, 32>}, {pipeline_mode = #tpu.pipeline_mode<synchronous>, transform_indices = @transform_2, window_bounds = array<i64: 72, 64>}, {transform_indices = @transform_3, window_bounds = array<i64: 8, 32>}]} {
    %c0 = arith.constant 0 : index
    %c0_0 = arith.constant 0 : index
    %0 = vector.load %arg2[%c0, %c0_0] : memref<184x32xf32, #tpu.memory_space<vmem>>, vector<32x32xf32>
    %c32 = arith.constant 32 : index
    %c0_1 = arith.constant 0 : index
    %1 = vector.load %arg2[%c32, %c0_1] : memref<184x32xf32, #tpu.memory_space<vmem>>, vector<32x32xf32>
    %c64 = arith.constant 64 : index
    %c0_2 = arith.constant 0 : index
    %2 = vector.load %arg2[%c64, %c0_2] : memref<184x32xf32, #tpu.memory_space<vmem>>, vector<64x32xf32>
    %c128 = arith.constant 128 : index
    %c0_3 = arith.constant 0 : index
    %3 = vector.load %arg2[%c128, %c0_3] : memref<184x32xf32, #tpu.memory_space<vmem>>, vector<32x32xf32>
    %c160 = arith.constant 160 : index
    %c0_4 = arith.constant 0 : index
    %4 = vector.load %arg2[%c160, %c0_4] : memref<184x32xf32, #tpu.memory_space<vmem>>, vector<8x32xf32>
    %5 = vector.extract_strided_slice %4 {offsets = [0, 0], sizes = [1, 32], strides = [1, 1]} : vector<8x32xf32> to vector<1x32xf32>
    %6 = vector.extract_strided_slice %4 {offsets = [1, 0], sizes = [1, 32], strides = [1, 1]} : vector<8x32xf32> to vector<1x32xf32>
    %7 = vector.extract_strided_slice %4 {offsets = [2, 0], sizes = [1, 32], strides = [1, 1]} : vector<8x32xf32> to vector<1x32xf32>
    %8 = vector.extract_strided_slice %4 {offsets = [3, 0], sizes = [1, 32], strides = [1, 1]} : vector<8x32xf32> to vector<1x32xf32>
    %9 = vector.extract_strided_slice %4 {offsets = [4, 0], sizes = [1, 32], strides = [1, 1]} : vector<8x32xf32> to vector<1x32xf32>
    %10 = vector.extract_strided_slice %4 {offsets = [5, 0], sizes = [1, 32], strides = [1, 1]} : vector<8x32xf32> to vector<1x32xf32>
    %11 = vector.extract_strided_slice %4 {offsets = [6, 0], sizes = [1, 32], strides = [1, 1]} : vector<8x32xf32> to vector<1x32xf32>
    %12 = vector.extract_strided_slice %4 {offsets = [7, 0], sizes = [1, 32], strides = [1, 1]} : vector<8x32xf32> to vector<1x32xf32>
    %c168 = arith.constant 168 : index
    %c0_5 = arith.constant 0 : index
    %13 = vector.load %arg2[%c168, %c0_5] : memref<184x32xf32, #tpu.memory_space<vmem>>, vector<4x32xf32>
    %c176 = arith.constant 176 : index
    %c0_6 = arith.constant 0 : index
    %14 = vector.load %arg2[%c176, %c0_6] : memref<184x32xf32, #tpu.memory_space<vmem>>, vector<1x32xf32>
    %c0_7 = arith.constant 0 : index
    %c0_8 = arith.constant 0 : index
    %15 = vector.load %arg3[%c0_7, %c0_8] : memref<72x64xf32, #tpu.memory_space<vmem>>, vector<32x64xf32>
    %c32_9 = arith.constant 32 : index
    %c0_10 = arith.constant 0 : index
    %16 = vector.load %arg3[%c32_9, %c0_10] : memref<72x64xf32, #tpu.memory_space<vmem>>, vector<32x64xf32>
    %c64_11 = arith.constant 64 : index
    %c0_12 = arith.constant 0 : index
    %17 = vector.load %arg3[%c64_11, %c0_12] : memref<72x64xf32, #tpu.memory_space<vmem>>, vector<1x64xf32>
    %c65 = arith.constant 65 : index
    %c0_13 = arith.constant 0 : index
    %18 = vector.load %arg3[%c65, %c0_13] : memref<72x64xf32, #tpu.memory_space<vmem>>, vector<1x64xf32>
    %c0_14 = arith.constant 0 : index
    %c0_15 = arith.constant 0 : index
    %19 = vector.load %arg1[%c0_14, %c0_15] : memref<40x32xf32, #tpu.memory_space<vmem>>, vector<32x32xf32>
    %c32_16 = arith.constant 32 : index
    %c0_17 = arith.constant 0 : index
    %20 = vector.load %arg1[%c32_16, %c0_17] : memref<40x32xf32, #tpu.memory_space<vmem>>, vector<1x32xf32>
    %cst = arith.constant dense<0.000000e+00> : vector<32x32xf32>
    %21 = tpu.matmul %19, %3, %cst {dimension_numbers = #tpu.dot_dimension_numbers<[1], [0], [0], [1], [0, 0, 1, 1], [], []>} : vector<32x32xf32>, vector<32x32xf32>, vector<32x32xf32> -> vector<32x32xf32>
    %22 = vector.broadcast %20 : vector<1x32xf32> to vector<32x32xf32>
    %23 = arith.addf %22, %21 : vector<32x32xf32>
    %24 = vector.broadcast %5 : vector<1x32xf32> to vector<32x32xf32>
    %25 = arith.addf %23, %24 : vector<32x32xf32>
    %cst_18 = arith.constant dense<0.000000e+00> : vector<32xf32>
    %26 = vector.multi_reduction <add>, %25, %cst_18 [1] : vector<32x32xf32> to vector<32xf32>
    %27 = vector.shape_cast %26 : vector<32xf32> to vector<32x1xf32>
    %cst_19 = arith.constant 3.200000e+01 : f32
    %28 = vector.broadcast %cst_19 : f32 to vector<32x1xf32>
    %29 = arith.divf %27, %28 : vector<32x1xf32>
    %30 = vector.broadcast %29 : vector<32x1xf32> to vector<32x32xf32>
    %31 = arith.subf %25, %30 : vector<32x32xf32>
    %32 = arith.mulf %31, %31 : vector<32x32xf32>
    %cst_20 = arith.constant dense<0.000000e+00> : vector<32xf32>
    %33 = vector.multi_reduction <add>, %32, %cst_20 [1] : vector<32x32xf32> to vector<32xf32>
    %34 = vector.shape_cast %33 : vector<32xf32> to vector<32x1xf32>
    %cst_21 = arith.constant 3.200000e+01 : f32
    %35 = vector.broadcast %cst_21 : f32 to vector<32x1xf32>
    %36 = arith.divf %34, %35 : vector<32x1xf32>
    %37 = vector.broadcast %29 : vector<32x1xf32> to vector<32x32xf32>
    %38 = arith.subf %25, %37 : vector<32x32xf32>
    %cst_22 = arith.constant 9.99999974E-6 : f32
    %39 = vector.broadcast %cst_22 : f32 to vector<32x1xf32>
    %40 = arith.addf %36, %39 : vector<32x1xf32>
    %41 = math.rsqrt %40 : vector<32x1xf32>
    %42 = vector.broadcast %41 : vector<32x1xf32> to vector<32x32xf32>
    %43 = arith.mulf %38, %42 : vector<32x32xf32>
    %44 = vector.broadcast %6 : vector<1x32xf32> to vector<32x32xf32>
    %45 = arith.mulf %43, %44 : vector<32x32xf32>
    %46 = vector.broadcast %7 : vector<1x32xf32> to vector<32x32xf32>
    %47 = arith.addf %45, %46 : vector<32x32xf32>
    %cst_23 = arith.constant dense<0.000000e+00> : vector<32x64xf32>
    %48 = tpu.matmul %47, %15, %cst_23 {dimension_numbers = #tpu.dot_dimension_numbers<[1], [0], [0], [1], [0, 0, 1, 1], [], []>} : vector<32x32xf32>, vector<32x64xf32>, vector<32x64xf32> -> vector<32x64xf32>
    %49 = vector.broadcast %17 : vector<1x64xf32> to vector<32x64xf32>
    %50 = arith.addf %48, %49 : vector<32x64xf32>
    %51 = vector.extract_strided_slice %50 {offsets = [0, 0], sizes = [32, 32], strides = [1, 1]} : vector<32x64xf32> to vector<32x32xf32>
    %52 = vector.extract_strided_slice %50 {offsets = [0, 32], sizes = [32, 32], strides = [1, 1]} : vector<32x64xf32> to vector<32x32xf32>
    %53 = vector.extract_strided_slice %25 {offsets = [0, 0], sizes = [1, 32], strides = [1, 1]} : vector<32x32xf32> to vector<1x32xf32>
    %54 = vector.extract_strided_slice %47 {offsets = [0, 0], sizes = [1, 32], strides = [1, 1]} : vector<32x32xf32> to vector<1x32xf32>
    %cst_24 = arith.constant dense<0.000000e+00> : vector<1x32xf32>
    %55 = tpu.matmul %54, %0, %cst_24 {dimension_numbers = #tpu.dot_dimension_numbers<[1], [0], [0], [1], [0, 0, 1, 1], [], []>} : vector<1x32xf32>, vector<32x32xf32>, vector<1x32xf32> -> vector<1x32xf32>
    %56 = arith.addf %55, %8 : vector<1x32xf32>
    %57 = vector.shape_cast %56 : vector<1x32xf32> to vector<1x32xf32>
    %58 = vector.broadcast %57 : vector<1x32xf32> to vector<4x32xf32>
    %59 = arith.mulf %58, %13 : vector<4x32xf32>
    %cst_25 = arith.constant dense<0.000000e+00> : vector<4x32xf32>
    %60 = tpu.matmul %59, %51, %cst_25 {dimension_numbers = #tpu.dot_dimension_numbers<[1], [1], [0], [0], [0, 0, 1, 0], [], []>} : vector<4x32xf32>, vector<32x32xf32>, vector<4x32xf32> -> vector<4x32xf32>
    %cst_26 = arith.constant 0.353553385 : f32
    %61 = vector.broadcast %cst_26 : f32 to vector<4x32xf32>
    %62 = arith.mulf %60, %61 : vector<4x32xf32>
    %63 = vector.broadcast %14 : vector<1x32xf32> to vector<4x32xf32>
    %64 = arith.addf %62, %63 : vector<4x32xf32>
    %cst_27 = arith.constant dense<0xFF800000> : vector<4xf32>
    %65 = vector.multi_reduction <maximumf>, %64, %cst_27 [1] : vector<4x32xf32> to vector<4xf32>
    %66 = vector.shape_cast %65 : vector<4xf32> to vector<4x1xf32>
    %67 = vector.broadcast %66 : vector<4x1xf32> to vector<4x32xf32>
    %68 = arith.subf %64, %67 : vector<4x32xf32>
    %69 = math.exp %68 : vector<4x32xf32>
    %cst_28 = arith.constant dense<0.000000e+00> : vector<4xf32>
    %70 = vector.multi_reduction <add>, %69, %cst_28 [1] : vector<4x32xf32> to vector<4xf32>
    %71 = vector.shape_cast %70 : vector<4xf32> to vector<4x1xf32>
    %72 = tpu.reciprocal %71 : vector<4x1xf32> -> vector<4x1xf32>
    %73 = vector.broadcast %72 : vector<4x1xf32> to vector<4x32xf32>
    %74 = arith.mulf %69, %73 : vector<4x32xf32>
    %cst_29 = arith.constant dense<0.000000e+00> : vector<4x32xf32>
    %75 = tpu.matmul %74, %52, %cst_29 {dimension_numbers = #tpu.dot_dimension_numbers<[1], [0], [0], [1], [0, 0, 1, 1], [], []>} : vector<4x32xf32>, vector<32x32xf32>, vector<4x32xf32> -> vector<4x32xf32>
    %76 = arith.mulf %75, %13 : vector<4x32xf32>
    %cst_30 = arith.constant dense<0.000000e+00> : vector<32xf32>
    %77 = vector.multi_reduction <add>, %76, %cst_30 [0] : vector<4x32xf32> to vector<32xf32>
    %78 = vector.shape_cast %77 : vector<32xf32> to vector<1x32xf32>
    %cst_31 = arith.constant dense<0.000000e+00> : vector<1x32xf32>
    %79 = tpu.matmul %78, %1, %cst_31 {dimension_numbers = #tpu.dot_dimension_numbers<[1], [0], [0], [1], [0, 0, 1, 1], [], []>} : vector<1x32xf32>, vector<32x32xf32>, vector<1x32xf32> -> vector<1x32xf32>
    %80 = arith.addf %79, %9 : vector<1x32xf32>
    %81 = arith.addf %53, %80 : vector<1x32xf32>
    %cst_32 = arith.constant dense<0.000000e+00> : vector<1xf32>
    %82 = vector.multi_reduction <add>, %81, %cst_32 [1] : vector<1x32xf32> to vector<1xf32>
    %83 = vector.shape_cast %82 : vector<1xf32> to vector<1x1xf32>
    %cst_33 = arith.constant 3.200000e+01 : f32
    %84 = vector.broadcast %cst_33 : f32 to vector<1x1xf32>
    %85 = arith.divf %83, %84 : vector<1x1xf32>
    %86 = vector.broadcast %85 : vector<1x1xf32> to vector<1x32xf32>
    %87 = arith.subf %81, %86 : vector<1x32xf32>
    %88 = arith.mulf %87, %87 : vector<1x32xf32>
    %cst_34 = arith.constant dense<0.000000e+00> : vector<1xf32>
    %89 = vector.multi_reduction <add>, %88, %cst_34 [1] : vector<1x32xf32> to vector<1xf32>
    %90 = vector.shape_cast %89 : vector<1xf32> to vector<1x1xf32>
    %cst_35 = arith.constant 3.200000e+01 : f32
    %91 = vector.broadcast %cst_35 : f32 to vector<1x1xf32>
    %92 = arith.divf %90, %91 : vector<1x1xf32>
    %93 = vector.broadcast %85 : vector<1x1xf32> to vector<1x32xf32>
    %94 = arith.subf %81, %93 : vector<1x32xf32>
    %cst_36 = arith.constant 9.99999974E-6 : f32
    %95 = vector.broadcast %cst_36 : f32 to vector<1x1xf32>
    %96 = arith.addf %92, %95 : vector<1x1xf32>
    %97 = math.rsqrt %96 : vector<1x1xf32>
    %98 = vector.broadcast %97 : vector<1x1xf32> to vector<1x32xf32>
    %99 = arith.mulf %94, %98 : vector<1x32xf32>
    %100 = arith.mulf %99, %10 : vector<1x32xf32>
    %101 = arith.addf %100, %11 : vector<1x32xf32>
    %cst_37 = arith.constant dense<0.000000e+00> : vector<1x64xf32>
    %102 = tpu.matmul %101, %16, %cst_37 {dimension_numbers = #tpu.dot_dimension_numbers<[1], [0], [0], [1], [0, 0, 1, 1], [], []>} : vector<1x32xf32>, vector<32x64xf32>, vector<1x64xf32> -> vector<1x64xf32>
    %103 = arith.addf %102, %18 : vector<1x64xf32>
    %cst_38 = arith.constant 0.000000e+00 : f32
    %104 = vector.broadcast %cst_38 : f32 to vector<1x64xf32>
    %105 = arith.maximumf %103, %104 : vector<1x64xf32>
    %cst_39 = arith.constant dense<0.000000e+00> : vector<1x32xf32>
    %106 = tpu.matmul %105, %2, %cst_39 {dimension_numbers = #tpu.dot_dimension_numbers<[1], [0], [0], [1], [0, 0, 1, 1], [], []>} : vector<1x64xf32>, vector<64x32xf32>, vector<1x32xf32> -> vector<1x32xf32>
    %107 = arith.addf %106, %12 : vector<1x32xf32>
    %108 = arith.addf %81, %107 : vector<1x32xf32>
    %109 = vector.shape_cast %108 : vector<1x32xf32> to vector<1x32xf32>
    %110 = vector.broadcast %109 : vector<1x32xf32> to vector<8x32xf32>
    %c0_40 = arith.constant 0 : index
    %c0_41 = arith.constant 0 : index
    %111 = vector.load %arg4[%c0_40, %c0_41] : memref<8x32xf32, #tpu.memory_space<vmem>>, vector<8x32xf32>
    tpu.vector_store %arg4[%c0_40, %c0_41], %110 {strides = array<i32>} : memref<8x32xf32, #tpu.memory_space<vmem>>, vector<8x32xf32>,
    return
  }
  func.func @transform_0(%arg0: i32) -> (i32, i32) {
    %c0_i32 = arith.constant 0 : i32
    %c0_i32_0 = arith.constant 0 : i32
    return %arg0, %c0_i32 : i32, i32
  }
  func.func @transform_1(%arg0: i32) -> (i32, i32) {
    %c0_i32 = arith.constant 0 : i32
    %c0_i32_0 = arith.constant 0 : i32
    %c0_i32_1 = arith.constant 0 : i32
    return %c0_i32, %c0_i32_0 : i32, i32
  }
  func.func @transform_2(%arg0: i32) -> (i32, i32) {
    %c0_i32 = arith.constant 0 : i32
    %c0_i32_0 = arith.constant 0 : i32
    %c0_i32_1 = arith.constant 0 : i32
    return %c0_i32, %c0_i32_0 : i32, i32
  }
  func.func @transform_3(%arg0: i32) -> (i32, i32) {
    %c0_i32 = arith.constant 0 : i32
    %c0_i32_0 = arith.constant 0 : i32
    return %arg0, %c0_i32 : i32, i32
  }
}

</mosaic_0001>

<bundles_post_ra>
// kernel: tpu_custom_call.1
= control target key start
LH: loop header
LB: loop body
LE: loop exit
PB: predicated region body
PF: predicated region fallthrough
CT: control target
= control target key end

     0   :  { %8 = vsyncpa [#allocation3], 0  ;;  %s1725_s0 = inlined_call_operand.vmem [shape: f32[80,32], index: 0, kind: input, shape index: {}]   ;;  %s1726_s1 = inlined_call_operand.vmem [shape: f32[184,32], index: 1, kind: input, shape index: {}]   ;;  %s1727_s2 = inlined_call_operand.vmem [shape: f32[72,64], index: 2, kind: input, shape index: {}]   ;;  %s1728_s3 = inlined_call_operand.hbm [shape: f32[16,32], index: 3, kind: output, shape index: {}]  }
   0x1   :  { %10 = vsyncpa [#allocation3 + $0x1], 0  ;;  %s1417_s12 = smov 0   ;;  %s1419_s13 = smov 0  }
   0x2   :  { %s1421_s14 = smov 0   ;;  %s1423_s15 = smov 0  }
   0x3 LB: > { %s1438_s16 = sadd.s32 4294967295, %s1391_s15   ;;  %s1092_s17 = sadd.s32 4294967294, %s1391_s15   ;;  %s1391_s15 = sphi %s1423_s15, %s1734_s15   ;;  %s1387_s14 = sphi %s1421_s14, %s1733_s14   ;;  %s1383_s13 = sphi %s1419_s13, %s1732_s13   ;;  %s1379_s12 = sphi %s1417_s12, %s1731_s12  }
   0x4   : > { %s1442_s18 = sadd.s32 1, %s1391_s15   ;;  %s91_s19 = sadd.s32 1, %s1387_s14 }
   0x5   : > { %s88_s20 = ssub.s32 %s1391_s15, %s1442_s18  ;;  %p101_p0 = scmp.ne.s32.totalorder %s1387_s14, %s1383_s13 }
   0x6   : > { %p89_p1 = scmp.eq.s32.totalorder %s88_s20, 0  ;;  %p102_p2 = scmp.eq.s32.totalorder %s1438_s16, 1 }
   0x7   : > { %p107_p3 = scmp.ne.s32.totalorder %s1383_s13, %s1379_s12  ;;  %p108_p4 = scmp.eq.s32.totalorder %s1092_s17, 1 }
   0x8   : > { %s1453_s21 = scalar_select %p89_p1, %s1387_s14, %s91_s19  }
   0x9   : > { %p1455_p5 = por %p102_p2, %p101_p0  ;;  %p1459_p6 = por %p108_p4, %p107_p3 }
   0xa   : > { %p1095_p7 = scmp.ge.s32.totalorder %s1391_s15, 1  ;;  %p141_p8 = scmp.lt.s32.totalorder %s1391_s15, 3 }
   0xc   : > { %p142_p9 = pnand %p1095_p7, %p141_p8 }
   0xd   : > { %s165_s28 = smul.u32 (!%p142_p9), 5, %s1438_s16  ;;  %s1395_s17 = smov (!%p142_p9), 96  }
   0xe   : > { %145 = sbr.rel (%p142_p9) target bundleno = 2385 (0x951), region = 32  ;;  %s162_s24 = sand.u32 (!%p142_p9), 1, %s1383_s13  }
   0xf   : > { %p166_p10 = scmp.lt.s32.totalorder (!%p142_p9), %s165_s28, 9  ;;  %s1096_s25 = sshll.u32 (!%p142_p9), %s162_s24, 3 }
  0x10   : > { %s1120_s26 = sshll.u32 (!%p142_p9), %s1438_s16, 7  ;;  %s164_s27 = scalar_lea.vmem (!%p142_p9), [#allocation2], %s1096_s25 }
  0x11   : > { %s1031_s4 = scalar_lea.hbm (!%p142_p9), %s1728_s3, %s1120_s26  ;;  %s1020_s5 = scalar_lea.sflag (!%p142_p9), [#allocation3], %s162_s24 }
  0x12   : > { %s1396_s16 = smov (!%p142_p9), [#allocation2]  }
  0x13   : > { %v190_v0 = vld [vmem:[%s1726_s1 + $0x98] sm:$0xff]  ;;  %v189_v1 = vld [vmem:[%s1726_s1 + $0x90] sm:$0xff]  ;;  %v188_v2 = vld [vmem:[%s1726_s1 + $0x88] sm:$0xff]  ;;  %s1736_s28 = smov (!%p166_p10, %s165_s28), 9  ;;  %vm209_vm0 = vcmask 261120   ;;  %v315_v8 = vlaneseq  ;;  %v1393_v50 = vmov 0.0  }
  0x14   : > { %1173 = vmatprep.subr.mxu1 %v190_v0  ;;  %v187_v3 = vld [vmem:[%s1726_s1 + $0x80] sm:$0xff]  ;;  %s1097_s6 = sshll.u32 %s1736_s28, 3  ;;  %1201 = vmatprep.subr.mxu0 %v1393_v50  ;;  %v174_v51 = vld [vmem:[%s1726_s1 + $0x18] sm:$0xff]  ;;  %v173_v52 = vld [vmem:[%s1726_s1 + $0x10] sm:$0xff]  ;;  %vm1394_vm1 = vmmov 0   ;;  %vm662_vm2 = vcmask 257024  }
  0x15   : > { %1174 = vmatpush3.msra.mxu1 %v190_v0  ;;  %s169_s9 = scalar_lea.vmem %s1725_s0, %s1097_s6  ;;  %v1485_v9 = vshrl.u32 %v315_v8, 7  ;;  %v1493_v13 = vld [vmem:[%s1726_s1 + $0xa0] sm:$0xff]  ;;  %1202 = vmatpush3.msra.mxu0 %v174_v51  ;;  %v197_v53 = vld [vmem:[%s1727_s2 + $0x18] sm:$0xff]  ;;  %v172_v54 = vld [vmem:[%s1726_s1 + $0x8] sm:$0xff]  ;;  %vm843_vm3 = vcmask 253952   ;;  %vm939_vm4 = vcmask 523264  }
  0x16   : > { %1175 = vmatprep.subr.mxu1 %v189_v1  ;;  %v204_v4 = vld [vmem:[%s169_s9] sm:$0xff]  ;;  %v205_v5 = vld [vmem:[%s169_s9 + $0x8] sm:$0xff]  ;;  %v206_v6 = vld [vmem:[%s169_s9 + $0x10] sm:$0xff]  ;;  %1203 = vmatprep.subr.mxu0 %v1393_v50  ;;  %s1033_s28 = sshll.u32 %s164_s27, 4  ;;  %s1335_s7 = sshll.u32 %s1396_s16, 4  ;;  %s1034_s28 = int_to_ptr.vmem [resolvable:$true] %s1033_s28  ;;  %s1336_s7 = int_to_ptr.vmem [resolvable:$false] %s1335_s7 }
  0x17   : > { %1176 = vmatpush3.msra.mxu1 %v189_v1  ;;  %1181 = vmatprep.mubr.msk.f32.mxu1 %vm209_vm0, %v204_v4  ;;  %v207_v7 = vld [vmem:[%s169_s9 + $0x18] sm:$0xff]  ;;  %v1488_v10 = vsub.s32 0, %v1485_v9  ;;  %v1102_v11 = vld [vmem:[%s169_s9 + $0x20] ss:$0 sm:$0xff]  ;;  %v196_v55 = vld [vmem:[%s1727_s2 + $0x10] sm:$0xff]  ;;  %v386_v8 = vsub.s32 2, %v1485_v9  ;;  %p1338_p0 = scmp.lt.s32.totalorder %s1034_s28, %s1336_s7 }
  0x18   : > { %1177 = vmatprep.subr.mxu1 %v188_v2  ;;  %1204 = vmatpush3.msra.mxu0 %v173_v52  ;;  %v171_v56 = vld [vmem:[%s1726_s1] sm:$0xff]  ;;  %v195_v57 = vld [vmem:[%s1727_s2 + $0x8] sm:$0xff]  ;;  %s1331_s6 = scalar_lea.vmem %s1034_s28, 128  ;;  %s1337_s8 = scalar_lea.vmem %s1336_s7, 256 }
  0x19   : > { %1178 = vmatpush3.msra.mxu1 %v188_v2  ;;  %v318_v17 = vrot.slane %v1493_v13, %v1488_v10  ;;  %1205 = vmatprep.subr.mxu0 %v1393_v50  ;;  %v194_v58 = vld [vmem:[%s1727_s2] sm:$0xff]  ;;  %p1332_p11 = scmp.ne.s32.totalorder %s1034_s28, %s1331_s6  ;;  %p1339_p1 = scmp.lt.s32.totalorder %s1337_s8, %s1331_s6 }
  0x1a   : > { %1179 = vmatprep.subr.mxu1 %v187_v3  ;;  %1206 = vmatpush3.msra.mxu0 %v172_v54 }
  0x1b   : > { %1180 = vmatpush3.msra.mxu1 %v187_v3  ;;  %1207 = vmatprep.subr.mxu0 %v1393_v50  ;;  %p1333_p12 = pnand %p1332_p11, %p1455_p5  ;;  %p1340_p2 = por %p1339_p1, %p1338_p0 }
  0x1c   : > { %1182 = vmatmul.mubr.msk.f32.vlgmr.msra.gmra.mxu1 %vm209_vm0, %v205_v5  ;;  %1187 = vmatprep.subr.mxu1 %v197_v53 }
  0x1d   : > { %1184 = vmatprep.mubr.msk.f32.mxu1 %vm209_vm0, %v206_v6  ;;  %1188 = vmatpush3.msra.mxu1 %v197_v53  ;;  %p1334_p13 = pneg %p1333_p12 }
  0x1e   : > { %1189 = vmatprep.subr.mxu1 %v196_v55  ;;  %1208 = vmatpush3.msra.mxu0 %v171_v56 }
  0x1f   : > { %1190 = vmatpush3.msra.mxu1 %v196_v55  ;;  %1209 = vmatprep.mubr.msk.f32.mxu0 %vm1394_vm1, %v1393_v50  ;;  %p1341_p3 = pnand %p1340_p2, %p1334_p13 }
  0x20   : > { %1185 = vmatmul.mubr.msk.f32.gmra.mxu1 %vm209_vm0, %v207_v7  ;;  %1191 = vmatprep.subr.mxu1 %v195_v57  ;;  %v378_v7 = vsub.s32 1, %v1485_v9 }
  0x21   : > { %1192 = vmatpush3.msra.mxu1 %v195_v57  ;;  %1223 = vmatprep.subr.mxu0 %v1393_v50 }
  0x22   : > { %1193 = vmatprep.subr.mxu1 %v194_v58 }
  0x23   : > { %1194 = vmatpush3.msra.mxu1 %v194_v58 }
  0x24   : > { %1212 = vmatprep.subr.mxu1 %v1393_v50 }
  0xdc   : > { %v1183_v12 = vpop.f32.mrf.mxu1 }
  0xdd   : > { %v312_v15 = vadd.f32 %v1183_v12, %v1102_v11 }
  0xde   : > { %v288_v14 = vpop.f32.mrf.mxu1 }
  0xdf   : > { %v311_v16 = vadd.f32 %v1102_v11, %v288_v14  ;;  %v320_v24 = vadd.f32 %v318_v17, %v312_v15  ;;  %v387_v15 = vrot.slane %v1493_v13, %v386_v8 }
  0xe0   : > { %v1186_v18 = vpop.f32.mrf.mxu1 }
  0xe1   : > { %v1497_v19 = vadd.f32 %v318_v17, %v311_v16  ;;  %v314_v21 = vadd.f32 %v1186_v18, %v1102_v11  ;;  %v326_v26 = vsel %vm209_vm0, %v320_v24, 0.0 }
  0xe2   : > { %v298_v20 = vpop.f32.mrf.mxu1 }
  0xe3   : > { %v313_v22 = vadd.f32 %v1102_v11, %v298_v20  ;;  %v323_v23 = vsel %vm209_vm0, %v1497_v19, 0.0  ;;  %v322_v28 = vadd.f32 %v318_v17, %v314_v21  ;;  %v379_v11 = vrot.slane %v1493_v13, %v378_v7 }
  0xe4   : > { %324 = vadd.xlane.f32.xlu0 %v323_v23 }
  0xe5   : > { %v321_v25 = vadd.f32 %v318_v17, %v313_v22  ;;  %v332_v29 = vsel %vm209_vm0, %v322_v28, 0.0 }
  0xe7   : > { %v329_v27 = vsel %vm209_vm0, %v321_v25, 0.0 }
  0xe8   : > { %327 = vadd.xlane.f32.xlu0 %v326_v26  ;;  %330 = vadd.xlane.f32.xlu1 %v329_v27 }
  0xec   : > { %333 = vadd.xlane.f32.xlu1 %v332_v29 }
 0x16d   : > { %v325_v30 = vpop.xlane.xlu0 %324 }
 0x16e   : > { %v336_v31 = vmul.f32 0.03125, %v325_v30 }
 0x170   : > { %v1505_v32 = vsub.f32 %v1497_v19, %v336_v31 }
 0x171   : > { %v328_v33 = vpop.xlane.xlu0 %327  ;;  %v331_v34 = vpop.xlane.xlu1 %330 }
 0x172   : > { %v337_v35 = vmul.f32 0.03125, %v328_v33  ;;  %v338_v36 = vmul.f32 0.03125, %v331_v34  ;;  %v344_v37 = vmul.f32 %v1505_v32, %v1505_v32  ;;  %v1103_v34 = vld [vmem:[%s1727_s2 + $0x40] ss:$0 sm:$0xff] }
 0x174   : > { %v1509_v38 = vsub.f32 %v320_v24, %v337_v35  ;;  %v1511_v39 = vsub.f32 %v321_v25, %v338_v36  ;;  %v348_v40 = vsel %vm209_vm0, %v344_v37, 0.0 }
 0x175   : > { %349 = vadd.xlane.f32.xlu0 %v348_v40  ;;  %v334_v41 = vpop.xlane.xlu1 %333 }
 0x176   : > { %v339_v42 = vmul.f32 0.03125, %v334_v41  ;;  %v345_v43 = vmul.f32 %v1509_v38, %v1509_v38  ;;  %v346_v44 = vmul.f32 %v1511_v39, %v1511_v39 }
 0x178   : > { %v1518_v45 = vsub.f32 %v322_v28, %v339_v42  ;;  %v351_v46 = vsel %vm209_vm0, %v345_v43, 0.0  ;;  %v354_v47 = vsel %vm209_vm0, %v346_v44, 0.0  ;;  %v192_v43 = vld [vmem:[%s1726_s1 + $0xa8] sm:$0xf] }
 0x179   : > { %352 = vadd.xlane.f32.xlu1 %v351_v46  ;;  %355 = vadd.xlane.f32.xlu0 %v354_v47  ;;  %v1114_v47 = vld [vmem:[%s1726_s1 + $0xb0] ss:$0 sm:$0xff] }
 0x17a   : > { %v347_v48 = vmul.f32 %v1518_v45, %v1518_v45 }
 0x17c   : > { %v357_v49 = vsel %vm209_vm0, %v347_v48, 0.0 }
 0x17d   : > { %358 = vadd.xlane.f32.xlu1 %v357_v49 }
 0x1fe   : > { %v350_v59 = vpop.xlane.xlu0 %349 }
 0x1ff   : > { %v360_v60 = vmul.f32 0.03125, %v350_v59 }
 0x201   : > { %v364_v61 = vadd.f32 1e-05, %v360_v60 }
 0x202   : > { %v356_v62 = vpop.xlane.xlu0 %355  ;;  %v353_v63 = vpop.xlane.xlu1 %352 }
 0x203   : > { %1317 = vrsqrt.f32 %v364_v61  ;;  %v362_v0 = vmul.f32 0.03125, %v356_v62  ;;  %v361_v1 = vmul.f32 0.03125, %v353_v63 }
 0x205   : > { %v366_v2 = vadd.f32 1e-05, %v362_v0  ;;  %v365_v3 = vadd.f32 1e-05, %v361_v1  ;;  %v178_v1 = vld [vmem:[%s1726_s1 + $0x38] sm:$0xff] }
 0x206   : > { %v359_v4 = vpop.xlane.xlu1 %358 }
 0x207   : > { %1319 = vrsqrt.f32 %v366_v2  ;;  %v363_v5 = vmul.f32 0.03125, %v359_v4  ;;  %v177_v2 = vld [vmem:[%s1726_s1 + $0x30] sm:$0xff]  ;;  %v175_v4 = vld [vmem:[%s1726_s1 + $0x20] sm:$0xff] }
 0x208   : > { %1321 = vrsqrt.f32 %v365_v3  ;;  %v176_v3 = vld [vmem:[%s1726_s1 + $0x28] sm:$0xff] }
 0x209   : > { %v367_v6 = vadd.f32 1e-05, %v363_v5 }
 0x20b   : > { %1323 = vrsqrt.f32 %v367_v6 }
 0x210   : > { %v1318_v12 = vpop.eup %1317 }
 0x211   : > { %v372_v14 = vmul.f32 %v1318_v12, %v1505_v32 }
 0x213   : > { %v380_v16 = vmul.f32 %v379_v11, %v372_v14 }
 0x214   : > { %v1320_v17 = vpop.eup %1319 }
 0x215   : > { %v1322_v18 = vpop.eup %1321  ;;  %v388_v20 = vadd.f32 %v387_v15, %v380_v16  ;;  %v374_v21 = vmul.f32 %v1320_v17, %v1511_v39  ;;  %v494_v39 = vrot.slane %v1493_v13, 3 }
 0x216   : > { %v373_v22 = vmul.f32 %v1322_v18, %v1509_v38  ;;  %v767_v18 = vrot.slane %v1493_v13, 4 }
 0x217   : > { %1195 = vmatprep.mubr.msk.f32.mxu1 %vm209_vm0, %v388_v20  ;;  %1210 = vmatmul.mubr.msk.f32.vlgmr.msra.gmra.mxu0 %vm209_vm0, %v388_v20  ;;  %v382_v9 = vmul.f32 %v379_v11, %v374_v21 }
 0x218   : > { %v1324_v23 = vpop.eup %1323  ;;  %v381_v24 = vmul.f32 %v379_v11, %v373_v22  ;;  %1231 = vmatprep.mubr.msk.f32.mxu0 %vm1394_vm1, %v1393_v50 }
 0x219   : > { %v390_v25 = vadd.f32 %v387_v15, %v382_v9  ;;  %v375_v26 = vmul.f32 %v1324_v23, %v1518_v45 }
 0x21a   : > { %v389_v27 = vadd.f32 %v387_v15, %v381_v24 }
 0x21b   : > { %v383_v28 = vmul.f32 %v379_v11, %v375_v26 }
 0x21c   : > { %1196 = vmatmul.mubr.msk.f32.vlgmr.msra.gmra.mxu1 %vm209_vm0, %v389_v27 }
 0x21d   : > { %1198 = vmatprep.mubr.msk.f32.mxu1 %vm209_vm0, %v390_v25  ;;  %v391_v29 = vadd.f32 %v387_v15, %v383_v28 }
 0x220   : > { %1199 = vmatmul.mubr.msk.f32.gmra.mxu1 %vm209_vm0, %v391_v29  ;;  %v201_v29 = vld [vmem:[%s1727_s2 + $0x38] sm:$0xff] }
 0x221   : > { %1220 = vmatprep.mubr.msk.f32.mxu1 %vm1394_vm1, %v1393_v50 }
 0x2d7   : > { %v562_v30 = vpop.f32.mrf.mxu0 }
 0x2d8   : > { %v563_v41 = vadd.f32 %v562_v30, %v494_v39  ;;  %v199_v30 = vld [vmem:[%s1727_s2 + $0x28] sm:$0xff] }
 0x2d9   : > { %v1211_v31 = vpop.f32.mrf.mxu0 }
 0x2da   : > { %v569_v42 = vrot.slane %v563_v41, %v1488_v10  ;;  %v198_v31 = vld [vmem:[%s1727_s2 + $0x20] sm:$0xff] }
 0x2dc   : > { %v1197_v32 = vpop.f32.mrf.mxu1  ;;  %v570_v45 = vmul.f32 %v569_v42, %v192_v43 }
 0x2dd   : > { %v480_v40 = vadd.f32 %v1197_v32, %v1103_v34  ;;  %v186_v32 = vld [vmem:[%s1726_s1 + $0x78] sm:$0xff] }
 0x2de   : > { %v474_v33 = vpop.f32.mrf.mxu1 }
 0x2df   : > { %v475_v44 = vadd.f32 %v1103_v34, %v474_v33  ;;  %v185_v33 = vld [vmem:[%s1726_s1 + $0x70] sm:$0xff] }
 0x2e0   : > { %v1200_v35 = vpop.f32.mrf.mxu1 }
 0x2e1   : > { %v490_v36 = vadd.f32 %v1200_v35, %v1103_v34  ;;  %v183_v35 = vld [vmem:[%s1726_s1 + $0x60] sm:$0xff] }
 0x2e2   : > { %v484_v37 = vpop.f32.mrf.mxu1 }
 0x2e3   : > { %v485_v38 = vadd.f32 %v1103_v34, %v484_v37  ;;  %1213 = vmatpush3.xpose.msk.msra.mxu1 %vm209_vm0, %v490_v36  ;;  %v184_v34 = vld [vmem:[%s1726_s1 + $0x68] sm:$0xff] }
 0x2e4   : > { %1214 = vmatprep.subr.mxu1 %v1393_v50 }
 0x2e5   : > { %678 = vrot.lane.b32.xlu1 %v485_v38, %s1395_s17 }
 0x2e7   : > { %1215 = vmatpush3.xpose.msk.msra.mxu1 %vm209_vm0, %v485_v38 }
 0x2e8   : > { %1216 = vmatprep.subr.mxu1 %v1393_v50 }
 0x2e9   : > { %676 = vrot.lane.b32.xlu1 %v480_v40, %s1395_s17 }
 0x2eb   : > { %1217 = vmatpush3.xpose.msk.msra.mxu1 %vm209_vm0, %v480_v40  ;;  %v857_v40 = vrot.slane %v1493_v13, 5 }
 0x2ec   : > { %1218 = vmatprep.subr.mxu1 %v1393_v50 }
 0x2ef   : > { %1219 = vmatpush3.xpose.msk.msra.mxu1 %vm209_vm0, %v475_v44 }
 0x2f0   : > { %1245 = vmatprep.subr.mxu1 %v1393_v50 }
 0x2f2   : > { %1221 = vmatmul.mubr.msk.f32.vlgmr.msra.gmra.mxu1 %vm209_vm0, %v570_v45 }
 0x2f3   : > { %1253 = vmatprep.mubr.msk.f32.mxu1 %vm1394_vm1, %v1393_v50  ;;  %1246 = vmatpush3.msra.mxu1 %v201_v29 }
 0x2f4   : > { %1247 = vmatprep.subr.mxu1 %v1393_v50 }
 0x357   : > { %v679_v55 = vpop.permute.xlu1 %678 }
 0x35b   : > { %v677_v58 = vpop.permute.xlu1 %676 }
 0x3b2   : > { %v652_v46 = vpop.f32.mrf.mxu1 }
 0x3b3   : > { %v656_v48 = vmul.f32 0.35355338, %v652_v46  ;;  %v181_v46 = vld [vmem:[%s1726_s1 + $0x50] sm:$0xff] }
 0x3b4   : > { %v1222_v49 = vpop.f32.mrf.mxu1 }
 0x3b5   : > { %v661_v51 = vadd.f32 %v1114_v47, %v656_v48  ;;  %v180_v47 = vld [vmem:[%s1726_s1 + $0x48] sm:$0xff]  ;;  %v179_v48 = vld [vmem:[%s1726_s1 + $0x40] sm:$0xff] }
 0x3b6   : > { %v203_v49 = vld [vmem:[%s1727_s2 + $0x41] sm:$0x1] }
 0x3b7   : > { %v663_v52 = vsel %vm662_vm2, %v661_v51, -inf }
 0x3b8   : > { %664 = vmax.xlane.f32.xlu0 %v663_v52 }
 0x3ce   : > { %680 = vrot.lane.b32.xlu0 %v490_v36, %s1395_s17  ;;  %v182_v36 = vld [vmem:[%s1726_s1 + $0x58] sm:$0xff] }
 0x441   : > { %v665_v53 = vpop.xlane.xlu0 %664 }
 0x442   : > { %v666_v54 = vsub.f32 %v661_v51, %v665_v53 }
 0x444   : > { %v667_v56 = vmul.f32 1.442695, %v666_v54 }
 0x445   : > { %v681_v57 = vpop.permute.xlu0 %680 }
 0x446   : > { %1325 = vpow2.f32 %v667_v56  ;;  %1224 = vmatpush3.msra.mxu0 %v681_v57 }
 0x447   : > { %1225 = vmatprep.subr.mxu0 %v1393_v50 }
 0x448   : > { %1226 = vmatpush3.msra.mxu0 %v679_v55 }
 0x449   : > { %1227 = vmatprep.subr.mxu0 %v1393_v50 }
 0x44a   : > { %1228 = vmatpush3.msra.mxu0 %v677_v58 }
 0x44b   : > { %1229 = vmatprep.subr.mxu0 %v1393_v50 }
 0x453   : > { %v1326_v59 = vpop.eup %1325 }
 0x454   : > { %v669_v60 = vsel %vm662_vm2, %v1326_v59, 0.0 }
 0x455   : > { %670 = vadd.xlane.f32.xlu1 %v669_v60 }
 0x466   : > { %674 = vrot.lane.b32.xlu1 %v475_v44, %s1395_s17 }
 0x4de   : > { %v671_v61 = vpop.xlane.xlu1 %670 }
 0x4df   : > { %1327 = vrcp.f32 %v671_v61 }
 0x4e2   : > { %v675_v62 = vpop.permute.xlu1 %674 }
 0x4e3   : > { %1230 = vmatpush3.msra.mxu0 %v675_v62 }
 0x4e4   : > { %1234 = vmatprep.subr.mxu0 %v1393_v50 }
 0x4ec   : > { %v1328_v63 = vpop.eup %1327 }
 0x4ed   : > { %v673_v0 = vmul.f32 %v1328_v63, %v1326_v59 }
 0x4ef   : > { %1232 = vmatmul.mubr.msk.f32.vlgmr.msra.gmra.mxu0 %vm209_vm0, %v673_v0 }
 0x4f0   : > { %1242 = vmatprep.mubr.msk.f32.mxu0 %vm1394_vm1, %v1393_v50  ;;  %1235 = vmatpush3.msra.mxu0 %v178_v1 }
 0x4f1   : > { %1236 = vmatprep.subr.mxu0 %v1393_v50 }
 0x4f2   : > { %1237 = vmatpush3.msra.mxu0 %v177_v2 }
 0x4f3   : > { %1238 = vmatprep.subr.mxu0 %v1393_v50 }
 0x4f4   : > { %1239 = vmatpush3.msra.mxu0 %v176_v3 }
 0x4f5   : > { %1240 = vmatprep.subr.mxu0 %v1393_v50 }
 0x4f6   : > { %1241 = vmatpush3.msra.mxu0 %v175_v4 }
 0x4f7   : > { %1256 = vmatprep.subr.mxu0 %v1393_v50 }
 0x5af   : > { %v755_v5 = vpop.f32.mrf.mxu0 }
 0x5b0   : > { %v759_v6 = vmul.f32 %v755_v5, %v192_v43  ;;  %v860_v43 = vrot.slane %v1493_v13, 6 }
 0x5b1   : > { %v1233_v7 = vpop.f32.mrf.mxu0 }
 0x5b2   : > { %v760_v8 = vsel %vm662_vm2, %v759_v6, 0.0 }
 0x5b3   : > { %v761_v11 = vrot.slane %v760_v8, 4 }
 0x5b5   : > { %v762_v12 = vadd.f32 %v761_v11, %v760_v8 }
 0x5b7   : > { %v763_v14 = vrot.slane %v762_v12, 2 }
 0x5b9   : > { %v764_v15 = vadd.f32 %v763_v14, %v762_v12 }
 0x5bb   : > { %v765_v16 = vrot.slane %v764_v15, 1 }
 0x5bd   : > { %v766_v17 = vadd.f32 %v765_v16, %v764_v15 }
 0x5bf   : > { %1243 = vmatmul.mubr.msk.f32.vlgmr.msra.gmra.mxu0 %vm209_vm0, %v766_v17 }
 0x5c0   : > { %1272 = vmatprep.mubr.msk.f32.mxu0 %vm1394_vm1, %v1393_v50  ;;  %1257 = vmatpush3.msra.mxu0 %v186_v32 }
 0x5c1   : > { %1258 = vmatprep.subr.mxu0 %v1393_v50 }
 0x5c2   : > { %1259 = vmatpush3.msra.mxu0 %v185_v33 }
 0x5c3   : > { %1260 = vmatprep.subr.mxu0 %v1393_v50 }
 0x5c4   : > { %1261 = vmatpush3.msra.mxu0 %v184_v34 }
 0x5c5   : > { %1262 = vmatprep.subr.mxu0 %v1393_v50 }
 0x5c6   : > { %1263 = vmatpush3.msra.mxu0 %v183_v35 }
 0x5c7   : > { %1264 = vmatprep.subr.mxu0 %v1393_v50 }
 0x5c8   : > { %1265 = vmatpush3.msra.mxu0 %v182_v36 }
 0x5c9   : > { %1266 = vmatprep.subr.mxu0 %v1393_v50 }
 0x5ca   : > { %1267 = vmatpush3.msra.mxu0 %v181_v46 }
 0x5cb   : > { %1268 = vmatprep.subr.mxu0 %v1393_v50 }
 0x5cc   : > { %1269 = vmatpush3.msra.mxu0 %v180_v47 }
 0x5cd   : > { %1270 = vmatprep.subr.mxu0 %v1393_v50 }
 0x5ce   : > { %1271 = vmatpush3.msra.mxu0 %v179_v48 }
 0x67f   : > { %v838_v20 = vpop.f32.mrf.mxu0 }
 0x680   : > { %v839_v21 = vadd.f32 %v838_v20, %v767_v18 }
 0x681   : > { %v1244_v22 = vpop.f32.mrf.mxu0 }
 0x682   : > { %v1631_v9 = vadd.f32 %v839_v21, %v1497_v19  ;;  %v200_v19 = vld [vmem:[%s1727_s2 + $0x30] sm:$0xff] }
 0x683   : > { %1248 = vmatpush3.msra.mxu1 %v200_v19 }
 0x684   : > { %v844_v23 = vsel %vm843_vm3, %v1631_v9, 0.0  ;;  %1249 = vmatprep.subr.mxu1 %v1393_v50 }
 0x685   : > { %845 = vadd.xlane.f32.xlu0 %v844_v23  ;;  %1250 = vmatpush3.msra.mxu1 %v199_v30 }
 0x686   : > { %1251 = vmatprep.subr.mxu1 %v1393_v50  ;;  %v937_v50 = vrot.slane %v1493_v13, 7 }
 0x687   : > { %1252 = vmatpush3.msra.mxu1 %v198_v31 }
 0x70e   : > { %v846_v24 = vpop.xlane.xlu0 %845 }
 0x70f   : > { %v847_v25 = vmul.f32 0.03125, %v846_v24 }
 0x711   : > { %v848_v26 = vsub.f32 %v1631_v9, %v847_v25 }
 0x713   : > { %v849_v27 = vmul.f32 %v848_v26, %v848_v26 }
 0x715   : > { %v850_v28 = vsel %vm843_vm3, %v849_v27, 0.0 }
 0x716   : > { %851 = vadd.xlane.f32.xlu1 %v850_v28 }
 0x79f   : > { %v852_v37 = vpop.xlane.xlu1 %851 }
 0x7a0   : > { %v853_v38 = vmul.f32 0.03125, %v852_v37 }
 0x7a2   : > { %v854_v39 = vadd.f32 1e-05, %v853_v38 }
 0x7a4   : > { %1329 = vrsqrt.f32 %v854_v39 }
 0x7b1   : > { %v1330_v41 = vpop.eup %1329 }
 0x7b2   : > { %v856_v42 = vmul.f32 %v1330_v41, %v848_v26 }
 0x7b4   : > { %v859_v44 = vmul.f32 %v857_v40, %v856_v42 }
 0x7b6   : > { %v862_v45 = vadd.f32 %v860_v43, %v859_v44 }
 0x7b8   : > { %1254 = vmatmul.mubr.msk.f32.vlgmr.msra.gmra.mxu1 %vm209_vm0, %v862_v45 }
 0x878   : > { %v932_v51 = vpop.f32.mrf.mxu1 }
 0x879   : > { %v933_v52 = vadd.f32 %v932_v51, %v203_v49 }
 0x87a   : > { %v1255_v53 = vpop.f32.mrf.mxu1 }
 0x87b   : > { %v936_v54 = vmax.f32 %v933_v52, 0.0 }
 0x87d   : > { %1273 = vmatmul.mubr.msk.f32.vlgmr.msra.gmra.mxu0 %vm939_vm4, %v936_v54 }
 0x93d   : > { %v1009_v55 = vpop.f32.mrf.mxu0 }
 0x93e   : > { %v1010_v56 = vadd.f32 %v1009_v55, %v937_v50 }
 0x93f   : > { %v1274_v57 = vpop.f32.mrf.mxu0 }
 0x940   : > { %v1013_v58 = vadd.f32 %v1010_v56, %v1631_v9 }
 0x942   : > { %v1017_v59 = vrot.slane %v1013_v58, %v1488_v10 }
 0x944   : > { %1018 = vst.msk [vmem:[%s164_s27] sm:$0xff] %vm209_vm0, %v1017_v59 }
 0x945   : > { %1344 = shalt.err (!%p1341_p3)
}
 0x946   : > { %s1345_s9 = scalar_lea.hbm %s1031_s4, 128  ;;  %s1349_s17 = scalar_lea.hbm %s1728_s3, 256 }
 0x947   : > { %p1346_p4 = scmp.ne.s32.totalorder %s1031_s4, %s1345_s9  ;;  %p1350_p9 = scmp.lt.s32.totalorder %s1031_s4, %s1728_s3 }
 0x948   : > { %p1351_p10 = scmp.lt.s32.totalorder %s1349_s17, %s1345_s9 }
 0x949   : > { %p1347_p7 = pnand %p1346_p4, %p1455_p5 }
 0x94a   : > { %p1352_p11 = por %p1351_p10, %p1350_p9 }
 0x94b   : > { %p1348_p8 = pneg %p1347_p7 }
 0x94d   : > { %p1353_p12 = pnand %p1352_p11, %p1348_p8 }
 0x94f   : > { %1356 = shalt.err (!%p1353_p12)
}
 0x950   : > { %1275 = dma.vmem_to_hbm [thread:$0]  (%p1455_p5), %s1034_s28, 128, %s1031_s4, %s1020_s5  }
 0x951 PF: > { %p1281_p13 = scmp.ge.s32.totalorder %s1391_s15, 2  ;;  %s1045_s24 = sand.u32 1, %s1379_s12  }
 0x952   : > { %s1046_s25 = scalar_lea.sflag [#allocation3], %s1045_s24 }
 0x953   : > { %p1278_p0 = pnand %p1281_p13, %p1459_p6 }
 0x955   : > { %p1279_p1 = pneg %p1278_p0 }
 0x957   : > { %1374 = dma.done.wait (%p1279_p1), %s1046_s25, 128  }
 0x958   : > { %1376 = vsyncadd (%p1279_p1), %s1046_s25, 4294967168  ;;  %p13_p2 = scmp.ge.s32.totalorder %s1442_s18, 4   ;;  %s1731_s12 = smov %s1383_s13 }
 0x959   : > { %s1732_s13 = smov %s1387_s14  ;;  %s1733_s14 = smov %s1453_s21 }
 0x95a   : > { %s1734_s15 = smov %s1442_s18  ;;  %15 = sbr.rel (!%p13_p2) target bundleno = 3 (0x3), region = 67 }
 0x95f   :  { %1051 = vsyncpa [#allocation3], 1 }
 0x960   :  { %1053 = vsyncpa [#allocation3 + $0x1], 1 }

</bundles_post_ra>
